<compile_context>
chip_gen: v6e
topology: v6e:2x2x1
jax: 0.10.0
libtpu: 0.0.40
codegen_flags: <defaults>
</compile_context>

<pallas_src>
import functools
import math

import jax
import jax.numpy as jnp
from jax import lax
from jax.experimental import pallas as pl
from jax.experimental.pallas import tpu as pltpu


def _round_up(x, m):
    return ((x + m - 1) // m) * m


# ---------------------------------------------------------------------------
# Fast path: table resident in VMEM; gather via (vocab-chunked) one-hot matmul.
# ---------------------------------------------------------------------------
def _embed_onehot_kernel(ids_ref, table_ref, out_ref, *, scale, vocab_chunk,
                         precision):
    # ids_ref  : (tb, 1)            int32 token ids for this block
    # table_ref: (vocab_pad, d)     full table, fetched once (Buffered(1))
    # out_ref  : (tb, d)
    tb, d_model = out_ref.shape
    vocab = table_ref.shape[0]
    ids = ids_ref[...]                                            # (tb, 1)

    if vocab <= vocab_chunk:
        # Single pass: one-hot over the whole (small) vocab.
        iota = lax.broadcasted_iota(jnp.int32, (tb, vocab), 1)
        onehot = (ids == iota).astype(table_ref.dtype)
        acc = jnp.dot(onehot, table_ref[...],
                      preferred_element_type=jnp.float32, precision=precision)
    else:
        # Chunked over vocab: bounds the (tb, chunk) one-hot working set.
        num_chunks = vocab // vocab_chunk   # wrapper pads vocab to a multiple

        def body(c, acc):
            start = pl.multiple_of(c * vocab_chunk, vocab_chunk)
            rows = table_ref[pl.ds(start, vocab_chunk), :]
            iota = lax.broadcasted_iota(jnp.int32, (tb, vocab_chunk), 1) + start
            onehot = (ids == iota).astype(rows.dtype)
            return acc + jnp.dot(onehot, rows,
                                 preferred_element_type=jnp.float32,
                                 precision=precision)

        acc = lax.fori_loop(0, num_chunks, body,
                            jnp.zeros((tb, d_model), jnp.float32))

    out_ref[...] = (acc * scale).astype(out_ref.dtype)


# ---------------------------------------------------------------------------
# Fallback: table stays in HBM; manual row gather DMA'd directly into out_ref.
# ---------------------------------------------------------------------------
def _embed_gather_kernel(ids_ref, table_hbm, out_ref, sems, *, scale,
                         n_inflight):
    # ids_ref  : (tb,)          int32 ids for this block, in SMEM
    # table_hbm: (vocab, d)     raw HBM ref
    # out_ref  : (tb, d)        pipelined output block; rows land here directly
    # sems     : (n_inflight,)  DMA semaphores
    tb = out_ref.shape[0]
    prime = min(n_inflight, tb)

    def start_row(r, token_id):
        pltpu.make_async_copy(
            table_hbm.at[pl.ds(token_id, 1), :],
            out_ref.at[pl.ds(r, 1), :],
            sems.at[r % n_inflight],
        ).start()

    def wait_row(r):
        # Wait only needs the transfer size + semaphore; use a constant src so
        # no SMEM id read / address math is redone just to wait.
        pltpu.make_async_copy(
            table_hbm.at[pl.ds(0, 1), :],
            out_ref.at[pl.ds(r, 1), :],
            sems.at[r % n_inflight],
        ).wait()

    # Static warm-up: keep `prime` row DMAs in flight.
    for r in range(prime):
        start_row(r, ids_ref[r])

    def body(r, carry):
        nxt = r + prime
        has_next = nxt < tb
        # Hoist the SMEM id read for the next DMA above the wait.
        nxt_id = ids_ref[jnp.where(has_next, nxt, 0)]
        wait_row(r)

        @pl.when(has_next)
        def _():
            start_row(nxt, nxt_id)

        return carry

    # Unrolled issue loop: batches descriptor issue / scalar work per iteration.
    # TODO(synk): padded tokens in the last block still issue (harmless) DMAs
    # for id 0; gate with the valid-row count if the pad fraction can be large.
    lax.fori_loop(0, tb, body, 0, unroll=4)

    # Scale in place (single pass over the output block; no extra VMEM copy).
    out_ref[...] = (out_ref[...].astype(jnp.float32) * scale).astype(out_ref.dtype)


# ---------------------------------------------------------------------------
# Wrapper
# ---------------------------------------------------------------------------
def input_embeddings(x, embedding_table, *, block_tokens=512, vocab_chunk=2048,
                     vmem_budget_fraction=0.7):
    """x: (B, S) int tokens; embedding_table: (vocab, d_model) -> (B, S, d_model)."""
    B, S = x.shape
    vocab, d_model = embedding_table.shape
    n = B * S
    scale = math.sqrt(float(d_model))
    itemsize = embedding_table.dtype.itemsize

    # Clamp ids (nn.Embedding would raise on OOB; here we stay in range).
    ids = jnp.clip(x.reshape(-1).astype(jnp.int32), 0, vocab - 1)

    # Token block: multiple of 8 (sublane-dense), capped at block_tokens.
    block_tokens = _round_up(max(int(block_tokens), 8), 8)
    tb = min(block_tokens, _round_up(n, 8))
    n_pad = _round_up(n, tb)
    if n_pad != n:
        ids = jnp.pad(ids, (0, n_pad - n))
    num_blocks = n_pad // tb

    # Per-TC VMEM budget for the fast (table-resident) path.
    try:
        vmem_cap = int(pltpu.get_tpu_info().vmem_capacity_bytes)
    except Exception:  # pragma: no cover - conservative default (v7x per-TC)
        vmem_cap = 64 * 1024 * 1024
    # TODO(synk): on v5e with f32 tables the one-hot MXU gather is ~3-6x less
    # favorable (no native f32 MXU path); a per-generation lower budget or a
    # bf16-served table would move the crossover.

    vocab_pad = vocab if vocab <= vocab_chunk else _round_up(vocab, vocab_chunk)
    chunk = min(vocab_pad, vocab_chunk)

    table_vmem = vocab_pad * d_model * itemsize          # single-buffered table
    out_vmem = 2 * tb * d_model * itemsize               # double-buffered output
    ids_vmem = 2 * tb * 4                                # double-buffered ids
    # one-hot (+ bf16-decomposition copies), one decomposed table chunk, f32 acc
    work_vmem = 4 * tb * chunk * itemsize + 2 * chunk * d_model * itemsize \
        + tb * d_model * 4
    fast_needed = table_vmem + out_vmem + ids_vmem + work_vmem
    use_fast_path = fast_needed <= int(vmem_budget_fraction * vmem_cap)

    if use_fast_path:
        table = embedding_table
        if vocab_pad != vocab:
            table = jnp.pad(embedding_table, ((0, vocab_pad - vocab), (0, 0)))
        # Exact gathered rows for f32 tables (avoid bf16-pass truncation).
        precision = (lax.Precision.HIGHEST
                     if embedding_table.dtype == jnp.float32 else None)
        ids2d = ids.reshape(n_pad, 1)
        vmem_limit = int(min(vmem_cap, fast_needed + (16 << 20)))

        out_flat = pl.pallas_call(
            functools.partial(_embed_onehot_kernel, scale=scale,
                              vocab_chunk=chunk, precision=precision),
            out_shape=jax.ShapeDtypeStruct((n_pad, d_model),
                                           embedding_table.dtype),
            grid_spec=pltpu.PrefetchScalarGridSpec(
                num_scalar_prefetch=0,
                grid=(num_blocks,),
                in_specs=[
                    pl.BlockSpec((tb, 1), lambda i: (i, 0)),         # ids block
                    # Full table, constant block index -> fetched once; single
                    # buffered so its VMEM footprint is x1, not x2.
                    pl.BlockSpec((vocab_pad, d_model), lambda i: (0, 0),
                                 pipeline_mode=pl.Buffered(1)),
                ],
                out_specs=pl.BlockSpec((tb, d_model), lambda i: (i, 0)),
            ),
            compiler_params=pltpu.CompilerParams(
                dimension_semantics=("parallel",),
                vmem_limit_bytes=vmem_limit),
        )(ids2d, table)
    else:
        n_inflight = min(16, tb)
        out_flat = pl.pallas_call(
            functools.partial(_embed_gather_kernel, scale=scale,
                              n_inflight=n_inflight),
            out_shape=jax.ShapeDtypeStruct((n_pad, d_model),
                                           embedding_table.dtype),
            grid_spec=pltpu.PrefetchScalarGridSpec(
                num_scalar_prefetch=0,
                grid=(num_blocks,),
                in_specs=[
                    # Per-block ids in SMEM (bounded; no whole-array prefetch).
                    pl.BlockSpec((tb,), lambda i: (i,),
                                 memory_space=pltpu.MemorySpace.SMEM),
                    pl.BlockSpec(memory_space=pl.ANY),               # HBM table
                ],
                out_specs=pl.BlockSpec((tb, d_model), lambda i: (i, 0)),
                scratch_shapes=[pltpu.SemaphoreType.DMA((n_inflight,))],
            ),
            compiler_params=pltpu.CompilerParams(
                dimension_semantics=("parallel",)),
        )(ids, embedding_table)

    return out_flat[:n].reshape(B, S, d_model)


if __name__ == "__main__":
    key = jax.random.PRNGKey(0)
    k_emb, k_tok, k_emb2, k_tok2 = jax.random.split(key, 4)

    # Case 1: small vocab -> single-pass one-hot fast path.
    d_model, vocab_size, B, S = 128, 64, 2, 8
    embedding_table = jax.random.normal(k_emb, (vocab_size, d_model),
                                        dtype=jnp.float32)
    x = jax.random.randint(k_tok, (B, S), minval=0, maxval=vocab_size,
                           dtype=jnp.int32)
    out = jax.block_until_ready(input_embeddings(x, embedding_table))
    ref = embedding_table[x] * math.sqrt(float(d_model))
    assert out.shape == (B, S, d_model), out.shape
    assert out.dtype == embedding_table.dtype, out.dtype
    assert jnp.allclose(out, ref, atol=1e-5, rtol=1e-5), "case1 mismatch"

    # Case 2: vocab larger than one chunk -> exercises in-kernel vocab tiling.
    vocab2 = 4096
    embedding_table2 = jax.random.normal(k_emb2, (vocab2, d_model),
                                         dtype=jnp.float32)
    x2 = jax.random.randint(k_tok2, (B, S), minval=0, maxval=vocab2,
                            dtype=jnp.int32)
    out2 = jax.block_until_ready(
        input_embeddings(x2, embedding_table2, vocab_chunk=1024))
    ref2 = embedding_table2[x2] * math.sqrt(float(d_model))
    assert jnp.allclose(out2, ref2, atol=1e-5, rtol=1e-5), "case2 mismatch"

    print("KERNEL_OK")
</pallas_src>

<mosaic_0001>
module attributes {stable_mosaic.version = 11 : i64} {
  func.func @_embed_onehot_kernel(%arg0: i32, %arg1: memref<16x1xi32, #tpu.memory_space<vmem>>, %arg2: memref<64x128xf32, #tpu.memory_space<vmem>>, %arg3: memref<16x128xf32, #tpu.memory_space<vmem>>) attributes {dimension_semantics = [#tpu.dimension_semantics<parallel>], iteration_bounds = array<i64: 1>, scalar_prefetch = 0 : i64, scratch_operands = 0 : i64, tpu.core_type = #tpu.core_type<tc>, window_params = [{transform_indices = @transform_0, window_bounds = array<i64: 16, 1>}, {pipeline_mode = #tpu.pipeline_mode<synchronous>, transform_indices = @transform_1, window_bounds = array<i64: 64, 128>}, {transform_indices = @transform_2, window_bounds = array<i64: 16, 128>}]} {
    %c0 = arith.constant 0 : index
    %c0_0 = arith.constant 0 : index
    %0 = vector.load %arg1[%c0, %c0_0] : memref<16x1xi32, #tpu.memory_space<vmem>>, vector<16x1xi32>
    %1 = tpu.iota {dimensions = array<i32: 1>} : vector<16x64xi32>
    %2 = vector.broadcast %0 : vector<16x1xi32> to vector<16x64xi32>
    %3 = arith.cmpi eq, %2, %1 : vector<16x64xi32>
    %4 = arith.extui %3 : vector<16x64xi1> to vector<16x64xi32>
    %5 = arith.sitofp %4 : vector<16x64xi32> to vector<16x64xf32>
    %c0_1 = arith.constant 0 : index
    %c0_2 = arith.constant 0 : index
    %6 = vector.load %arg2[%c0_1, %c0_2] : memref<64x128xf32, #tpu.memory_space<vmem>>, vector<64x128xf32>
    %cst = arith.constant dense<0.000000e+00> : vector<16x128xf32>
    %7 = tpu.matmul %5, %6, %cst {dimension_numbers = #tpu.dot_dimension_numbers<[1], [0], [0], [1], [0, 0, 1, 1], [], []>, precision = #tpu.contract_precision<fp32>} : vector<16x64xf32>, vector<64x128xf32>, vector<16x128xf32> -> vector<16x128xf32>
    %cst_3 = arith.constant 11.3137083 : f32
    %8 = vector.broadcast %cst_3 : f32 to vector<16x128xf32>
    %9 = arith.mulf %7, %8 : vector<16x128xf32>
    %c0_4 = arith.constant 0 : index
    %c0_5 = arith.constant 0 : index
    %10 = vector.load %arg3[%c0_4, %c0_5] : memref<16x128xf32, #tpu.memory_space<vmem>>, vector<16x128xf32>
    tpu.vector_store %arg3[%c0_4, %c0_5], %9 {strides = array<i32>} : memref<16x128xf32, #tpu.memory_space<vmem>>, vector<16x128xf32>,
    return
  }
  func.func @transform_0(%arg0: i32) -> (i32, i32) {
    %c0_i32 = arith.constant 0 : i32
    %c0_i32_0 = arith.constant 0 : i32
    return %arg0, %c0_i32 : i32, i32
  }
  func.func @transform_1(%arg0: i32) -> (i32, i32) {
    %c0_i32 = arith.constant 0 : i32
    %c0_i32_0 = arith.constant 0 : i32
    %c0_i32_1 = arith.constant 0 : i32
    return %c0_i32, %c0_i32_0 : i32, i32
  }
  func.func @transform_2(%arg0: i32) -> (i32, i32) {
    %c0_i32 = arith.constant 0 : i32
    %c0_i32_0 = arith.constant 0 : i32
    return %arg0, %c0_i32 : i32, i32
  }
}

</mosaic_0001>

<bundles_post_ra>
// kernel: tpu_custom_call.1
= control target key start
LH: loop header
LB: loop body
LE: loop exit
PB: predicated region body
PF: predicated region fallthrough
CT: control target
= control target key end

     0   :  { %7 = vsyncpa [#allocation3], 0  ;;  %s1110_s0 = inlined_call_operand.vmem [shape: s32[16,1], index: 0, kind: input, shape index: {}]   ;;  %s1111_s1 = inlined_call_operand.hbm [shape: f32[64,128], index: 1, kind: input, shape index: {}]   ;;  %s1112_s2 = inlined_call_operand.hbm [shape: f32[16,128], index: 2, kind: output, shape index: {}]  }
   0x1   :  { %8 = vsyncpa [#allocation4], 0  ;;  %s891_s9 = smov [#allocation2]  }
   0x2   :  { %s16_s10 = sshll.u32 %s891_s9, 4  ;;  %s17_s10 = int_to_ptr.vmem [resolvable:$true] %s16_s10 }
   0x3   :  { %s855_s11 = scalar_lea.vmem %s17_s10, 1024  ;;  %p860_p1 = scmp.lt.s32.totalorder %s17_s10, %s17_s10 }
   0x4   :  { %p856_p0 = scmp.ne.s32.totalorder %s17_s10, %s855_s11  ;;  %p861_p2 = scmp.lt.s32.totalorder %s855_s11, %s855_s11 }
   0x6   :  { %p862_p3 = por %p861_p2, %p860_p1 }
   0x8   :  { %p863_p4 = pnand %p862_p3, %p856_p0 }
   0xa   :  { %866 = shalt.err (!%p863_p4)
}
   0xb   :  { %s892_s12 = smov 128   ;;  %s893_s13 = smov 8  }
   0xc   :  { %22 = dma.hbm_to_vmem [thread:$0]  %s1111_s1, 1024, %s17_s10, [#allocation3], %s892_s12, %s892_s12, %s893_s13  }
   0xd   :  { %887 = dma.done.wait [#allocation3], 1024  }
   0xe   :  { %888 = vsyncadd [#allocation3], 4294966272  ;;  %v894_v0 = vmov 0   ;;  %v26_v1 = vld [vmem:[%s1110_s0] sm:$0xff]  ;;  %v27_v2 = vld [vmem:[%s1110_s0 + $0x8] sm:$0xff]  ;;  %v28_v51 = vlaneseq  ;;  %vm50_vm0 = vcmask 523264  }
   0xf   :  { %846 = vset.pattern.permute.xlu0 %v894_v0  ;;  %v49_v3 = vld [vmem:[#allocation2 + $0x38] sm:$0xff]  ;;  %v48_v5 = vld [vmem:[#allocation2 + $0x30] sm:$0xff]  ;;  %v47_v6 = vld [vmem:[#allocation2 + $0x28] sm:$0xff]  ;;  %v895_v54 = vmov 0.0   ;;  %s896_s0 = smov [#allocation5]  }
  0x10   :  { %31 = vperm.xlu0 %846, %v26_v1   ;;  %v924_v4 = vand.u32 4294901760, %v49_v3  ;;  %v46_v7 = vld [vmem:[#allocation2 + $0x20] sm:$0xff]  ;;  %v926_v8 = vand.u32 4294901760, %v48_v5  ;;  %v928_v9 = vand.u32 4294901760, %v47_v6  ;;  %v45_v11 = vld [vmem:[#allocation2 + $0x18] sm:$0xff]  ;;  %v44_v12 = vld [vmem:[#allocation2 + $0x10] sm:$0xff] }
  0x11   :  { %v930_v10 = vand.u32 4294901760, %v46_v7  ;;  %v43_v13 = vld [vmem:[#allocation2 + $0x8] sm:$0xff]  ;;  %v935_v15 = vand.u32 4294901760, %v45_v11  ;;  %v938_v16 = vand.u32 4294901760, %v44_v12  ;;  %v42_v18 = vld [vmem:[#allocation2] sm:$0xff]  ;;  %v29_v52 = vand.u32 127, %v28_v51 }
  0x12   :  { %v933_v14 = vsub.f32 %v49_v3, %v924_v4  ;;  %726 = vmatprep.subr.mxu0 %v924_v4  ;;  %v940_v17 = vand.u32 4294901760, %v43_v13  ;;  %v943_v19 = vsub.f32 %v48_v5, %v926_v8  ;;  %v946_v20 = vsub.f32 %v47_v6, %v928_v9  ;;  %s646_s1 = sshll.u32 %s896_s0, 4  ;;  %s647_s1 = int_to_ptr.vmem [resolvable:$true] %s646_s1 }
  0x13   :  { %v949_v21 = vsub.f32 %v46_v7, %v930_v10  ;;  %727 = vmatpush3.msra.mxu0 %v924_v4  ;;  %v956_v23 = vsub.f32 %v45_v11, %v935_v15  ;;  %v959_v24 = vsub.f32 %v44_v12, %v938_v16  ;;  %v962_v25 = vand.u32 4294901760, %v42_v18  ;;  %s867_s20 = scalar_lea.vmem %s647_s1, 256  ;;  %p872_p6 = scmp.lt.s32.totalorder %s647_s1, %s647_s1 }
  0x14   :  { %34 = vperm.xlu0 %846, %v27_v2   ;;  %v953_v22 = vand.u32 4294901760, %v933_v14  ;;  %728 = vmatprep.subr.mxu0 %v926_v8  ;;  %v965_v26 = vand.u32 4294901760, %v943_v19  ;;  %v968_v27 = vand.u32 4294901760, %v946_v20  ;;  %v980_v31 = vsub.f32 %v43_v13, %v940_v17  ;;  %p868_p5 = scmp.ne.s32.totalorder %s647_s1, %s867_s20  ;;  %p873_p7 = scmp.lt.s32.totalorder %s867_s20, %s867_s20 }
  0x15   :  { %v971_v28 = vand.u32 4294901760, %v949_v21  ;;  %729 = vmatpush3.msra.mxu0 %v926_v8  ;;  %v977_v30 = vand.u32 4294901760, %v956_v23  ;;  %v991_v36 = vand.u32 4294901760, %v959_v24  ;;  %v994_v37 = vsub.f32 %v42_v18, %v962_v25 }
  0x16   :  { %v170_v29 = vsub.f32 %v933_v14, %v953_v22  ;;  %730 = vmatprep.subr.mxu0 %v928_v9  ;;  %v177_v32 = vsub.f32 %v943_v19, %v965_v26  ;;  %v184_v33 = vsub.f32 %v946_v20, %v968_v27  ;;  %v1001_v41 = vand.u32 4294901760, %v980_v31  ;;  %p874_p8 = por %p873_p7, %p872_p6 }
  0x17   :  { %731 = vmatpush3.msra.mxu0 %v928_v9  ;;  %v191_v35 = vsub.f32 %v949_v21, %v971_v28  ;;  %v198_v40 = vsub.f32 %v956_v23, %v977_v30  ;;  %v205_v43 = vsub.f32 %v959_v24, %v991_v36  ;;  %v1008_v44 = vand.u32 4294901760, %v994_v37 }
  0x18   :  { %v171_v34 = vand.u32 4294901760, %v170_v29  ;;  %732 = vmatprep.subr.mxu0 %v930_v10  ;;  %v178_v38 = vand.u32 4294901760, %v177_v32  ;;  %v185_v39 = vand.u32 4294901760, %v184_v33  ;;  %v212_v46 = vsub.f32 %v980_v31, %v1001_v41  ;;  %p875_p9 = pnand %p874_p8, %p868_p5 }
  0x19   :  { %733 = vmatpush3.msra.mxu0 %v930_v10  ;;  %v192_v42 = vand.u32 4294901760, %v191_v35  ;;  %v199_v45 = vand.u32 4294901760, %v198_v40  ;;  %v206_v47 = vand.u32 4294901760, %v205_v43  ;;  %v219_v48 = vsub.f32 %v994_v37, %v1008_v44 }
  0x1a   :  { %745 = vmatprep.subr.mxu1 %v171_v34  ;;  %734 = vmatprep.subr.mxu0 %v935_v15  ;;  %v213_v49 = vand.u32 4294901760, %v212_v46 }
  0x1b   :  { %746 = vmatpush3.msra.mxu1 %v171_v34  ;;  %735 = vmatpush3.msra.mxu0 %v935_v15  ;;  %v220_v50 = vand.u32 4294901760, %v219_v48 }
  0x1c   :  { %747 = vmatprep.subr.mxu1 %v178_v38  ;;  %736 = vmatprep.subr.mxu0 %v938_v16 }
  0x1d   :  { %748 = vmatpush3.msra.mxu1 %v178_v38  ;;  %737 = vmatpush3.msra.mxu0 %v938_v16 }
  0x1e   :  { %749 = vmatprep.subr.mxu1 %v185_v39  ;;  %738 = vmatprep.subr.mxu0 %v940_v17 }
  0x1f   :  { %750 = vmatpush3.msra.mxu1 %v185_v39  ;;  %739 = vmatpush3.msra.mxu0 %v940_v17 }
  0x20   :  { %751 = vmatprep.subr.mxu1 %v192_v42  ;;  %740 = vmatprep.subr.mxu0 %v962_v25 }
  0x21   :  { %752 = vmatpush3.msra.mxu1 %v192_v42  ;;  %741 = vmatpush3.msra.mxu0 %v962_v25 }
  0x22   :  { %753 = vmatprep.subr.mxu1 %v199_v45  ;;  %764 = vmatprep.subr.mxu0 %v933_v14 }
  0x23   :  { %754 = vmatpush3.msra.mxu1 %v199_v45 }
  0x24   :  { %755 = vmatprep.subr.mxu1 %v206_v47 }
  0x25   :  { %756 = vmatpush3.msra.mxu1 %v206_v47 }
  0x26   :  { %757 = vmatprep.subr.mxu1 %v213_v49 }
  0x27   :  { %758 = vmatpush3.msra.mxu1 %v213_v49 }
  0x28   :  { %759 = vmatprep.subr.mxu1 %v220_v50 }
  0x29   :  { %760 = vmatpush3.msra.mxu1 %v220_v50 }
  0x2a   :  { %783 = vmatprep.subr.mxu1 %v924_v4 }
  0x8b   :  { %v32_v53 = vpop.permute.xlu0 %31 }
  0x8c   :  { %vm36_vm1 = vcmp.eq.s32.totalorder %v32_v53, %v29_v52 }
  0x8d   :  { %v1022_v55 = vsel %vm36_vm1, 1.0, %v895_v54 }
  0x8e   :  { %v52_v56 = vsel %vm50_vm0, %v1022_v55, 0  ;;  %761 = vmatprep.mubr.msk.f32.mxu1 %vm50_vm0, %v1022_v55 }
  0x8f   :  { %v131_v57 = vsub.f32 %v52_v56, %v52_v56  ;;  %v35_v58 = vpop.permute.xlu0 %34 }
  0x90   :  { %vm37_vm2 = vcmp.eq.s32.totalorder %v35_v58, %v29_v52 }
  0x91   :  { %v1028_v59 = vsel %vm37_vm2, 1.0, %v895_v54  ;;  %v132_v60 = vand.u32 4294901760, %v131_v57 }
  0x92   :  { %v55_v61 = vsel %vm50_vm0, %v1028_v59, 0  ;;  %762 = vmatmul.mubr.msk.f32.vlgmr.msra.gmra.mxu1 %vm50_vm0, %v1028_v59 }
  0x93   :  { %v141_v62 = vsub.f32 %v55_v61, %v55_v61  ;;  %784 = vmatpush3.msra.mxu1 %v924_v4  ;;  %799 = vmatprep.mubr.f32.mxu1 %v132_v60  ;;  %v133_v63 = vsub.f32 %v131_v57, %v132_v60 }
  0x94   :  { %785 = vmatprep.subr.mxu1 %v926_v8 }
  0x95   :  { %786 = vmatpush3.msra.mxu1 %v926_v8  ;;  %v134_v0 = vand.u32 4294901760, %v133_v63  ;;  %v142_v1 = vand.u32 4294901760, %v141_v62 }
  0x96   :  { %787 = vmatprep.subr.mxu1 %v928_v9 }
  0x97   :  { %788 = vmatpush3.msra.mxu1 %v928_v9  ;;  %742 = vmatprep.mubr.f32.mxu0 %v134_v0  ;;  %v143_v2 = vsub.f32 %v141_v62, %v142_v1 }
  0x98   :  { %789 = vmatprep.subr.mxu1 %v930_v10 }
  0x99   :  { %790 = vmatpush3.msra.mxu1 %v930_v10  ;;  %v144_v3 = vand.u32 4294901760, %v143_v2 }
  0x9a   :  { %791 = vmatprep.subr.mxu1 %v935_v15 }
  0x9b   :  { %792 = vmatpush3.msra.mxu1 %v935_v15  ;;  %743 = vmatmul.mubr.f32.vlgmr.msra.gmra.mxu0 %v144_v3 }
  0x9c   :  { %765 = vmatpush3.msra.mxu0 %v933_v14  ;;  %793 = vmatprep.subr.mxu1 %v938_v16 }
  0x9d   :  { %766 = vmatprep.subr.mxu0 %v943_v19  ;;  %780 = vmatprep.mubr.f32.mxu0 %v131_v57 }
  0x9e   :  { %794 = vmatpush3.msra.mxu1 %v938_v16  ;;  %767 = vmatpush3.msra.mxu0 %v943_v19 }
  0x9f   :  { %795 = vmatprep.subr.mxu1 %v940_v17  ;;  %768 = vmatprep.subr.mxu0 %v946_v20 }
  0xa0   :  { %796 = vmatpush3.msra.mxu1 %v940_v17  ;;  %769 = vmatpush3.msra.mxu0 %v946_v20 }
  0xa1   :  { %797 = vmatprep.subr.mxu1 %v962_v25  ;;  %770 = vmatprep.subr.mxu0 %v949_v21 }
  0xa2   :  { %798 = vmatpush3.msra.mxu1 %v962_v25  ;;  %771 = vmatpush3.msra.mxu0 %v949_v21 }
  0xa3   :  { %800 = vmatmul.mubr.f32.vlgmr.msra.gmra.mxu1 %v142_v1  ;;  %821 = vmatprep.subr.mxu1 %v924_v4 }
  0xa4   :  { %772 = vmatprep.subr.mxu0 %v956_v23  ;;  %822 = vmatpush3.msra.mxu1 %v924_v4 }
  0xa5   :  { %837 = vmatprep.mubr.msk.f32.mxu1 %vm50_vm0, %v1022_v55  ;;  %773 = vmatpush3.msra.mxu0 %v956_v23 }
  0xa6   :  { %823 = vmatprep.subr.mxu1 %v926_v8  ;;  %774 = vmatprep.subr.mxu0 %v959_v24 }
  0xa7   :  { %824 = vmatpush3.msra.mxu1 %v926_v8  ;;  %775 = vmatpush3.msra.mxu0 %v959_v24 }
  0xa8   :  { %825 = vmatprep.subr.mxu1 %v928_v9  ;;  %776 = vmatprep.subr.mxu0 %v980_v31 }
  0xa9   :  { %826 = vmatpush3.msra.mxu1 %v928_v9  ;;  %777 = vmatpush3.msra.mxu0 %v980_v31 }
  0xaa   :  { %827 = vmatprep.subr.mxu1 %v930_v10  ;;  %778 = vmatprep.subr.mxu0 %v994_v37 }
  0xab   :  { %828 = vmatpush3.msra.mxu1 %v930_v10  ;;  %779 = vmatpush3.msra.mxu0 %v994_v37 }
  0xac   :  { %829 = vmatprep.subr.mxu1 %v935_v15  ;;  %781 = vmatmul.mubr.f32.vlgmr.msra.gmra.mxu0 %v141_v62 }
  0xad   :  { %802 = vmatprep.subr.mxu0 %v953_v22  ;;  %830 = vmatpush3.msra.mxu1 %v935_v15 }
  0xae   :  { %803 = vmatpush3.msra.mxu0 %v953_v22  ;;  %818 = vmatprep.mubr.msk.f32.mxu0 %vm50_vm0, %v1022_v55 }
  0xaf   :  { %831 = vmatprep.subr.mxu1 %v938_v16  ;;  %804 = vmatprep.subr.mxu0 %v965_v26 }
  0xb0   :  { %832 = vmatpush3.msra.mxu1 %v938_v16  ;;  %805 = vmatpush3.msra.mxu0 %v965_v26 }
  0xb1   :  { %833 = vmatprep.subr.mxu1 %v940_v17  ;;  %806 = vmatprep.subr.mxu0 %v968_v27 }
  0xb2   :  { %834 = vmatpush3.msra.mxu1 %v940_v17  ;;  %807 = vmatpush3.msra.mxu0 %v968_v27 }
  0xb3   :  { %835 = vmatprep.subr.mxu1 %v962_v25  ;;  %808 = vmatprep.subr.mxu0 %v971_v28 }
  0xb4   :  { %836 = vmatpush3.msra.mxu1 %v962_v25  ;;  %809 = vmatpush3.msra.mxu0 %v971_v28 }
  0xb5   :  { %838 = vmatmul.mubr.msk.f32.vlgmr.msra.gmra.mxu1 %vm50_vm0, %v1028_v59  ;;  %810 = vmatprep.subr.mxu0 %v977_v30 }
  0xb6   :  { %811 = vmatpush3.msra.mxu0 %v977_v30 }
  0xb7   :  { %812 = vmatprep.subr.mxu0 %v991_v36 }
  0xb8   :  { %813 = vmatpush3.msra.mxu0 %v991_v36 }
  0xb9   :  { %814 = vmatprep.subr.mxu0 %v1001_v41 }
  0xba   :  { %815 = vmatpush3.msra.mxu0 %v1001_v41 }
  0xbb   :  { %816 = vmatprep.subr.mxu0 %v1008_v44 }
  0xbc   :  { %817 = vmatpush3.msra.mxu0 %v1008_v44 }
  0xbd   :  { %819 = vmatmul.mubr.msk.f32.vlgmr.msra.gmra.mxu0 %vm50_vm0, %v1028_v59 }
 0x152   :  { %v763_v5 = vpop.f32.mrf.mxu1 }
 0x154   :  { %v257_v8 = vpop.f32.mrf.mxu1 }
 0x15b   :  { %v744_v4 = vpop.f32.mrf.mxu0 }
 0x15c   :  { %v264_v9 = vadd.f32 %v763_v5, %v744_v4 }
 0x15d   :  { %v136_v6 = vpop.f32.mrf.mxu0 }
 0x15e   :  { %v258_v12 = vadd.f32 %v257_v8, %v136_v6 }
 0x163   :  { %v801_v10 = vpop.f32.mrf.mxu1 }
 0x165   :  { %v439_v15 = vpop.f32.mrf.mxu1 }
 0x16c   :  { %v782_v7 = vpop.f32.mrf.mxu0 }
 0x16d   :  { %v359_v13 = vadd.f32 %v782_v7, %v264_v9 }
 0x16e   :  { %v351_v11 = vpop.f32.mrf.mxu0 }
 0x16f   :  { %v352_v14 = vadd.f32 %v351_v11, %v258_v12  ;;  %v448_v16 = vadd.f32 %v801_v10, %v359_v13 }
 0x171   :  { %v440_v20 = vadd.f32 %v439_v15, %v352_v14 }
 0x175   :  { %v839_v17 = vpop.f32.mrf.mxu1 }
 0x177   :  { %v627_v24 = vpop.f32.mrf.mxu1 }
 0x17d   :  { %v820_v18 = vpop.f32.mrf.mxu0 }
 0x17e   :  { %v549_v19 = vadd.f32 %v820_v18, %v448_v16 }
 0x17f   :  { %v542_v21 = vpop.f32.mrf.mxu0 }
 0x180   :  { %v634_v22 = vadd.f32 %v839_v17, %v549_v19  ;;  %v543_v23 = vadd.f32 %v542_v21, %v440_v20 }
 0x182   :  { %v638_v25 = vmul.f32 11.313708, %v634_v22  ;;  %v628_v26 = vadd.f32 %v627_v24, %v543_v23 }
 0x184   :  { %640 = vst [vmem:[#allocation5 + $0x8] sm:$0xff] %v638_v25  ;;  %v637_v27 = vmul.f32 11.313708, %v628_v26 }
 0x186   :  { %639 = vst [vmem:[#allocation5] sm:$0xff] %v637_v27 }
 0x187   :  { %878 = shalt.err (!%p875_p9)
}
 0x188   :  { %652 = dma.vmem_to_hbm [thread:$0]  %s647_s1, 256, %s1112_s2, [#allocation4], %s892_s12, %s892_s12, %s893_s13  }
 0x189   :  { %889 = dma.done.wait [#allocation4], 256  }
 0x18a   :  { %890 = vsyncadd [#allocation4], 4294967040 }
 0x18b   :  { %656 = vsyncpa [#allocation3], 1 }
 0x18c   :  { %657 = vsyncpa [#allocation4], 1 }

</bundles_post_ra>
